<compile_context>
chip_gen: v7x
topology: tpu7x:2x2x1
jax: 0.10.0
libtpu: 0.0.40
codegen_flags: <defaults>
</compile_context>

<pallas_src>
import functools

import jax
import jax.numpy as jnp
import numpy as np
from jax.experimental import pallas as pl
from jax.experimental.pallas import tpu as pltpu

LANE = 128             # lane width (feature padding target)
HALF = 64              # lane offset where logvar / eps live
REC_OFF = 96           # lane offset of the reconstruction in the packed output
SUB = 8                # sublane multiple (batch padding target)
DEFAULT_TILE_B = 1024  # max batch tile (f32 slabs ~1 MiB, well under VMEM limits)


def _round_up(x, m):
    return ((x + m - 1) // m) * m


def vae_kernel(x_ref, w_ref, b_ref, out_ref, *, latent_dim):
    """x:(Tb,128) [s|a|s' @ 0:enc_in, eps @ 64:64+L]   w:(128,512)   b:(1,512)
       -> out:(Tb,128) packed [mu @ 0:L, logvar @ 64:64+L, recon @ 96:96+out_dim]."""
    f32 = jnp.float32
    x = x_ref[...]

    # One fused 128x256 dot:
    #   lanes [0,128)   -> packed heads: mu @ [0,L), logvar @ [64,64+L)
    #   lanes [128,256) -> decoder-hidden pre-activation contribution from x
    #                      ([s,a] rows + folded mu path), bias already folded in.
    y = jnp.dot(x, w_ref[:, 0:2 * LANE], preferred_element_type=f32) + b_ref[:, 0:2 * LANE]
    mulv = y[:, 0:LANE]          # mu @ [0,L), logvar @ [64,64+L), exactly 0 elsewhere

    # Reparameterize: eps sits in x at exactly the logvar lanes, so
    # x * exp(0.5*mulv) already equals eps*std there.  Mask every other lane
    # (cheap VPU select) so an overflowing exp on the mu lanes can never reach
    # the dot (inf*0 -> NaN protection).
    lane = jax.lax.broadcasted_iota(jnp.int32, x.shape, 1)
    in_z = (lane >= HALF) & (lane < HALF + latent_dim)
    eps_std = jnp.where(in_z, x * jnp.exp(0.5 * mulv), 0.0)

    # Decoder: Linear -> ReLU -> Linear (the x-part of layer 1 came from the
    # fused dot; W_de rows outside [64,64+L) are zero).
    hd = jnp.maximum(
        y[:, LANE:2 * LANE]
        + jnp.dot(eps_std, w_ref[:, 2 * LANE:3 * LANE], preferred_element_type=f32),
        0.0)
    recon = (jnp.dot(hd, w_ref[:, 3 * LANE:4 * LANE], preferred_element_type=f32)
             + b_ref[:, 3 * LANE:4 * LANE])   # nonzero only on lanes [96,96+out_dim)

    # mulv is zero on lanes >= 64+L (<= 96) and recon is zero on lanes < 96,
    # so one add packs both outputs; single full-width unmasked store.
    out_ref[...] = mulv + recon


def _batch_tiles(batch):
    b8 = _round_up(max(batch, 1), SUB)
    # >= 2 grid steps once the batch exceeds one sublane tile, so the "parallel"
    # axis shards across both TensorCores on v7x; capped by DEFAULT_TILE_B.
    tile_b = min(DEFAULT_TILE_B, max(SUB, _round_up((b8 + 1) // 2, SUB)))
    bp = _round_up(b8, tile_b)
    return tile_b, bp


def _vae_forward(w_all, b_all, s, a, s_next, eps, *, enc_in, latent_dim, out_dim):
    B = s.shape[0]
    L = latent_dim
    tile_b, Bp = _batch_tiles(B)

    # Glue (fused into this same jit): concat + zero-pad; eps -> lanes [64,64+L).
    x = jnp.concatenate([s, a, s_next], axis=1).astype(jnp.float32)
    xh = jnp.pad(x, ((0, 0), (0, HALF - enc_in)))
    eh = jnp.pad(eps.astype(jnp.float32), ((0, 0), (0, HALF - L)))
    xp = jnp.pad(jnp.concatenate([xh, eh], axis=1), ((0, Bp - B), (0, 0)))

    bat_spec = pl.BlockSpec((tile_b, LANE), lambda i: (i, 0))
    w_spec = pl.BlockSpec((LANE, 4 * LANE), lambda i: (0, 0))
    b_spec = pl.BlockSpec((1, 4 * LANE), lambda i: (0, 0))

    flops = 2 * Bp * LANE * (4 * LANE)                 # 3 dots: 256+128+128 out cols, K=128
    bytes_acc = 4 * (Bp * LANE                         # packed input slab
                     + LANE * 4 * LANE + 4 * LANE      # weights, biases
                     + Bp * LANE)                      # packed output slab

    packed = pl.pallas_call(
        functools.partial(vae_kernel, latent_dim=L),
        grid=(Bp // tile_b,),
        in_specs=[bat_spec, w_spec, b_spec],
        out_specs=bat_spec,
        out_shape=jax.ShapeDtypeStruct((Bp, LANE), jnp.float32),
        compiler_params=pltpu.CompilerParams(dimension_semantics=("parallel",)),
        cost_estimate=pl.CostEstimate(flops=flops, transcendentals=Bp * LANE,
                                      bytes_accessed=bytes_acc),
    )(xp, w_all, b_all)

    return (packed[:B, REC_OFF:REC_OFF + out_dim],     # s_next_recon
            packed[:B, 0:L],                           # mu
            packed[:B, HALF:HALF + L])                 # logvar


class TransitionVAE:
    def __init__(self, state_dim, action_dim, out_dim, hidden_dim=64,
                 hidden_layers=1, latent_dim=0, key=None):
        assert hidden_layers == 1, "kernel specialized to hidden_layers=1 (module default)"
        if key is None:
            key = jax.random.PRNGKey(0)
        self.state_dim, self.action_dim, self.out_dim = state_dim, action_dim, out_dim
        self.hidden_dim = hidden_dim
        self.latent_dim = latent_dim if latent_dim > 0 else (state_dim * 2 + action_dim + out_dim) // 2
        self.sa_dim = state_dim + action_dim
        self.enc_in = state_dim * 2 + action_dim
        dec_in = self.sa_dim + self.latent_dim
        H, L = hidden_dim, self.latent_dim
        # Packed-layout constraints (hold for SAC-sized problems).
        assert self.enc_in <= HALF, "eps-in-x packing needs 2*state_dim+action_dim <= 64"
        assert L <= REC_OFF - HALF, "packed output layout needs latent_dim <= 32"
        assert out_dim <= LANE - REC_OFF, "packed output layout needs out_dim <= 32"
        assert H <= LANE and dec_in <= LANE

        # ---- raw parameters (PyTorch nn.Linear init), kept in f64 for reference ----
        def linear(k, fan_in, fan_out):
            kw, kb = jax.random.split(k)
            bound = 1.0 / float(np.sqrt(fan_in))
            w = jax.random.uniform(kw, (fan_in, fan_out), jnp.float32, -bound, bound)
            b = jax.random.uniform(kb, (fan_out,), jnp.float32, -bound, bound)
            return np.asarray(w, np.float64), np.asarray(b, np.float64)

        ks = jax.random.split(key, 5)
        self.w_enc, self.b_enc = linear(ks[0], self.enc_in, H)
        self.w_mu, self.b_mu = linear(ks[1], H, L)
        self.w_lv, self.b_lv = linear(ks[2], H, L)
        self.w_d1, self.b_d1 = linear(ks[3], dec_in, H)
        self.w_d2, self.b_d2 = linear(ks[4], H, out_dim)

        # ---- algebraic fusion of the purely-linear encoder (host, float64) ----
        # Valid because build_net with a single layer applies the OUTPUT activation
        # (Identity) -> encoder is exactly one Linear with no nonlinearity.
        A = self.w_enc @ self.w_mu                      # x -> mu          (enc_in, L)
        a0 = self.b_enc @ self.w_mu + self.b_mu
        C = self.w_enc @ self.w_lv                      # x -> logvar      (enc_in, L)
        c0 = self.b_enc @ self.w_lv + self.b_lv
        D_sa = self.w_d1[:self.sa_dim]                  # (sa_dim, H)
        D_z = self.w_d1[self.sa_dim:]                   # (L, H)
        W_dx = A @ D_z                                  # mu path folded into decoder-1
        W_dx[:self.sa_dim] += D_sa                      # + the [s,a] part of decoder-1
        b_hd = self.b_d1 + a0 @ D_z                     # fused decoder-1 bias

        # ---- pack everything into one weight slab and one bias slab ----
        # cols [0,128)   : W_head  (mu cols @ [0,L), logvar cols @ [64,64+L))
        # cols [128,256) : W_dx    (x -> decoder hidden)
        # cols [256,384) : W_de    (eps*std -> decoder hidden; rows [64,64+L))
        # cols [384,512) : W_d2    (hidden -> recon, placed at lanes [96,96+out_dim))
        W = np.zeros((LANE, 4 * LANE), np.float64)
        Bv = np.zeros((1, 4 * LANE), np.float64)
        W[:self.enc_in, 0:L] = A
        W[:self.enc_in, HALF:HALF + L] = C
        W[:self.enc_in, LANE:LANE + H] = W_dx
        W[HALF:HALF + L, 2 * LANE:2 * LANE + H] = D_z
        W[:H, 3 * LANE + REC_OFF:3 * LANE + REC_OFF + out_dim] = self.w_d2
        Bv[0, 0:L] = a0
        Bv[0, HALF:HALF + L] = c0
        Bv[0, LANE:LANE + H] = b_hd
        Bv[0, 3 * LANE + REC_OFF:3 * LANE + REC_OFF + out_dim] = self.b_d2
        self.w_all = jnp.asarray(W, jnp.float32)        # (128, 512)
        self.b_all = jnp.asarray(Bv, jnp.float32)       # (1, 512)

        # Whole forward (glue + pallas_call + unpack) compiled as ONE function.
        self._forward = jax.jit(functools.partial(
            _vae_forward, enc_in=self.enc_in, latent_dim=L, out_dim=out_dim))

    def __call__(self, s, a, s_next, eps):
        return self._forward(self.w_all, self.b_all, s, a, s_next, eps)

    def reference(self, s, a, s_next, eps):
        # unfused numpy float64 reference of the PyTorch forward (gold standard)
        s, a, s_next, eps = (np.asarray(t, np.float64) for t in (s, a, s_next, eps))
        x = np.concatenate([s, a, s_next], axis=1)
        h = x @ self.w_enc + self.b_enc                 # encoder: Linear + Identity
        mu = h @ self.w_mu + self.b_mu
        logvar = h @ self.w_lv + self.b_lv
        z = mu + eps * np.exp(0.5 * logvar)
        xd = np.concatenate([s, a, z], axis=-1)
        hd = np.maximum(xd @ self.w_d1 + self.b_d1, 0.0)
        out = hd @ self.w_d2 + self.b_d2
        return out, mu, logvar


if __name__ == "__main__":
    key = jax.random.PRNGKey(0)
    k_params, k_s, k_a, k_sn, k_eps = jax.random.split(key, 5)

    state_dim, action_dim, out_dim = 12, 4, 12
    B = 8
    model = TransitionVAE(state_dim, action_dim, out_dim, key=k_params)
    # latent_dim = (12*2 + 4 + 12) // 2 = 20

    s = jax.random.normal(k_s, (B, state_dim), jnp.float32)
    a = jax.random.normal(k_a, (B, action_dim), jnp.float32)
    s_next = jax.random.normal(k_sn, (B, state_dim), jnp.float32)
    eps = jax.random.normal(k_eps, (B, model.latent_dim), jnp.float32)

    out, mu, logvar = model(s, a, s_next, eps)
    jax.block_until_ready((out, mu, logvar))

    ref_out, ref_mu, ref_lv = model.reference(s, a, s_next, eps)
    assert out.shape == (B, out_dim)
    assert mu.shape == (B, model.latent_dim) and logvar.shape == (B, model.latent_dim)
    np.testing.assert_allclose(np.asarray(out), ref_out, rtol=1e-4, atol=1e-4)
    np.testing.assert_allclose(np.asarray(mu), ref_mu, rtol=1e-4, atol=1e-4)
    np.testing.assert_allclose(np.asarray(logvar), ref_lv, rtol=1e-4, atol=1e-4)

    print("KERNEL_OK")
</pallas_src>

<mosaic_0001>
module attributes {stable_mosaic.version = 11 : i64} {
  func.func @vae_kernel(%arg0: i32, %arg1: memref<8x128xf32, #tpu.memory_space<vmem>>, %arg2: memref<128x512xf32, #tpu.memory_space<vmem>>, %arg3: memref<1x512xf32, #tpu.memory_space<vmem>>, %arg4: memref<8x128xf32, #tpu.memory_space<vmem>>) attributes {dimension_semantics = [#tpu.dimension_semantics<parallel>], iteration_bounds = array<i64: 1>, scalar_prefetch = 0 : i64, scratch_operands = 0 : i64, tpu.core_type = #tpu.core_type<tc>, window_params = [{transform_indices = @transform_0, window_bounds = array<i64: 8, 128>}, {pipeline_mode = #tpu.pipeline_mode<synchronous>, transform_indices = @transform_1, window_bounds = array<i64: 128, 512>}, {pipeline_mode = #tpu.pipeline_mode<synchronous>, transform_indices = @transform_2, window_bounds = array<i64: 1, 512>}, {transform_indices = @transform_3, window_bounds = array<i64: 8, 128>}]} {
    %c0 = arith.constant 0 : index
    %c0_0 = arith.constant 0 : index
    %0 = vector.load %arg1[%c0, %c0_0] : memref<8x128xf32, #tpu.memory_space<vmem>>, vector<8x128xf32>
    %c0_1 = arith.constant 0 : index
    %c0_2 = arith.constant 0 : index
    %1 = vector.load %arg2[%c0_1, %c0_2] : memref<128x512xf32, #tpu.memory_space<vmem>>, vector<128x256xf32>
    %cst = arith.constant dense<0.000000e+00> : vector<8x256xf32>
    %2 = tpu.matmul %0, %1, %cst {dimension_numbers = #tpu.dot_dimension_numbers<[1], [0], [0], [1], [0, 0, 1, 1], [], []>} : vector<8x128xf32>, vector<128x256xf32>, vector<8x256xf32> -> vector<8x256xf32>
    %c0_3 = arith.constant 0 : index
    %c0_4 = arith.constant 0 : index
    %3 = vector.load %arg3[%c0_3, %c0_4] : memref<1x512xf32, #tpu.memory_space<vmem>>, vector<1x256xf32>
    %4 = vector.broadcast %3 : vector<1x256xf32> to vector<8x256xf32>
    %5 = arith.addf %2, %4 : vector<8x256xf32>
    %6 = vector.extract_strided_slice %5 {offsets = [0, 0], sizes = [8, 128], strides = [1, 1]} : vector<8x256xf32> to vector<8x128xf32>
    %7 = tpu.iota {dimensions = array<i32: 1>} : vector<8x128xi32>
    %c64_i32 = arith.constant 64 : i32
    %8 = vector.broadcast %c64_i32 : i32 to vector<8x128xi32>
    %9 = arith.cmpi sge, %7, %8 : vector<8x128xi32>
    %c84_i32 = arith.constant 84 : i32
    %10 = vector.broadcast %c84_i32 : i32 to vector<8x128xi32>
    %11 = arith.cmpi slt, %7, %10 : vector<8x128xi32>
    %12 = arith.andi %9, %11 : vector<8x128xi1>
    %cst_5 = arith.constant 5.000000e-01 : f32
    %13 = vector.broadcast %cst_5 : f32 to vector<8x128xf32>
    %14 = arith.mulf %13, %6 : vector<8x128xf32>
    %15 = math.exp %14 : vector<8x128xf32>
    %16 = arith.mulf %0, %15 : vector<8x128xf32>
    %cst_6 = arith.constant 0.000000e+00 : f32
    %17 = vector.broadcast %cst_6 : f32 to vector<8x128xf32>
    %18 = arith.select %12, %16, %17 : vector<8x128xi1>, vector<8x128xf32>
    %19 = vector.extract_strided_slice %5 {offsets = [0, 128], sizes = [8, 128], strides = [1, 1]} : vector<8x256xf32> to vector<8x128xf32>
    %c0_7 = arith.constant 0 : index
    %c256 = arith.constant 256 : index
    %20 = vector.load %arg2[%c0_7, %c256] : memref<128x512xf32, #tpu.memory_space<vmem>>, vector<128x128xf32>
    %cst_8 = arith.constant dense<0.000000e+00> : vector<8x128xf32>
    %21 = tpu.matmul %18, %20, %cst_8 {dimension_numbers = #tpu.dot_dimension_numbers<[1], [0], [0], [1], [0, 0, 1, 1], [], []>} : vector<8x128xf32>, vector<128x128xf32>, vector<8x128xf32> -> vector<8x128xf32>
    %22 = arith.addf %19, %21 : vector<8x128xf32>
    %cst_9 = arith.constant 0.000000e+00 : f32
    %23 = vector.broadcast %cst_9 : f32 to vector<8x128xf32>
    %24 = arith.maximumf %22, %23 : vector<8x128xf32>
    %c0_10 = arith.constant 0 : index
    %c384 = arith.constant 384 : index
    %25 = vector.load %arg2[%c0_10, %c384] : memref<128x512xf32, #tpu.memory_space<vmem>>, vector<128x128xf32>
    %cst_11 = arith.constant dense<0.000000e+00> : vector<8x128xf32>
    %26 = tpu.matmul %24, %25, %cst_11 {dimension_numbers = #tpu.dot_dimension_numbers<[1], [0], [0], [1], [0, 0, 1, 1], [], []>} : vector<8x128xf32>, vector<128x128xf32>, vector<8x128xf32> -> vector<8x128xf32>
    %c0_12 = arith.constant 0 : index
    %c384_13 = arith.constant 384 : index
    %27 = vector.load %arg3[%c0_12, %c384_13] : memref<1x512xf32, #tpu.memory_space<vmem>>, vector<1x128xf32>
    %28 = vector.broadcast %27 : vector<1x128xf32> to vector<8x128xf32>
    %29 = arith.addf %26, %28 : vector<8x128xf32>
    %30 = arith.addf %6, %29 : vector<8x128xf32>
    %c0_14 = arith.constant 0 : index
    %c0_15 = arith.constant 0 : index
    %31 = vector.load %arg4[%c0_14, %c0_15] : memref<8x128xf32, #tpu.memory_space<vmem>>, vector<8x128xf32>
    tpu.vector_store %arg4[%c0_14, %c0_15], %30 {strides = array<i32>} : memref<8x128xf32, #tpu.memory_space<vmem>>, vector<8x128xf32>,
    return
  }
  func.func @transform_0(%arg0: i32) -> (i32, i32) {
    %c0_i32 = arith.constant 0 : i32
    %c0_i32_0 = arith.constant 0 : i32
    return %arg0, %c0_i32 : i32, i32
  }
  func.func @transform_1(%arg0: i32) -> (i32, i32) {
    %c0_i32 = arith.constant 0 : i32
    %c0_i32_0 = arith.constant 0 : i32
    %c0_i32_1 = arith.constant 0 : i32
    return %c0_i32, %c0_i32_0 : i32, i32
  }
  func.func @transform_2(%arg0: i32) -> (i32, i32) {
    %c0_i32 = arith.constant 0 : i32
    %c0_i32_0 = arith.constant 0 : i32
    %c0_i32_1 = arith.constant 0 : i32
    return %c0_i32, %c0_i32_0 : i32, i32
  }
  func.func @transform_3(%arg0: i32) -> (i32, i32) {
    %c0_i32 = arith.constant 0 : i32
    %c0_i32_0 = arith.constant 0 : i32
    return %arg0, %c0_i32 : i32, i32
  }
}

</mosaic_0001>

<bundles_post_ra>
// kernel: _vae_forward.1
= control target key start
LH: loop header
LB: loop body
LE: loop exit
PB: predicated region body
PF: predicated region fallthrough
CT: control target
= control target key end

     0   :  { %8 = vsyncpa [#allocation3], 0  ;;  %s560_s12 = smov [#allocation2]   ;;  %s633_s0 = inlined_call_operand.vmem [shape: f32[8,128], index: 0, kind: input, shape index: {}]   ;;  %s634_s1 = inlined_call_operand.hbm [shape: f32[128,512], index: 1, kind: input, shape index: {}]   ;;  %s635_s2 = inlined_call_operand.vmem [shape: f32[1,512], index: 2, kind: input, shape index: {}]   ;;  %s636_s3 = inlined_call_operand.vmem [shape: f32[8,128], index: 3, kind: output, shape index: {}]  }
   0x1   :  { %s16_s13 = sshll.u32 %s560_s12, 4  ;;  %s536_s16 = scalar_lea.hbm %s634_s1, 8192  ;;  %s17_s13 = int_to_ptr.vmem [resolvable:$true] %s16_s13 }
   0x2   :  { %p537_p0 = scmp.ne.s32.totalorder %s634_s1, %s536_s16  ;;  %p540_p1 = scmp.lt.u32.totalorder %s536_s16, %s634_s1 }
   0x4   :  { %p542_p2 = pnand %p540_p1, %p537_p0 }
   0x6   :  { %545 = shalt.err (!%p542_p2)
}
   0x7   :  { %s546_s21 = scalar_lea.vmem %s17_s13, 8192  ;;  %p551_p4 = scmp.lt.s32.totalorder %s17_s13, %s17_s13 }
   0x8   :  { %p547_p3 = scmp.ne.s32.totalorder %s17_s13, %s546_s21  ;;  %p552_p5 = scmp.lt.s32.totalorder %s546_s21, %s546_s21 }
   0xa   :  { %p553_p6 = por %p552_p5, %p551_p4 }
   0xc   :  { %p554_p7 = pnand %p553_p6, %p547_p3 }
   0xe   :  { %557 = shalt.err (!%p554_p7)
}
   0xf   :  { %s561_s22 = smov 512   ;;  %s562_s23 = smov 32  }
  0x10   :  { %22 = dma.hbm_to_vmem [thread:$0]  %s634_s1, 8192, %s17_s13, [#allocation3], %s561_s22, %s561_s22, %s562_s23  }
  0x11   :  { %558 = dma.done.wait [#allocation3], 8192  }
  0x12   :  { %559 = vsyncadd [#allocation3], 4294959104  ;;  %v563_v0 = vmov 0.0   ;;  %v564_v1 = vmov 0.0|0.0   ;;  %v30_v2 = vld [vmem:[#allocation2 + $0x8] sm:$0xff]  ;;  %v29_v4 = vld [vmem:[#allocation2] sm:$0xff] }
  0x13   :  { %137 = vmatprep.mubr.f32.mxu0 %v563_v0  ;;  %480 = vmatprep.subr.bf16.mxu1 %v564_v1  ;;  %v32_v3 = vld [vmem:[#allocation2 + $0x28] sm:$0xff]  ;;  %v31_v6 = vld [vmem:[#allocation2 + $0x20] sm:$0xff]  ;;  %v154_v27 = vld [vmem:[#allocation2 + $0x10] sm:$0xff]  ;;  %vm565_vm0 = vmmov 0  }
  0x14   :  { %v448_v5 = vpack.c.bf16 %v32_v3, %v30_v2  ;;  %v34_v7 = vld [vmem:[#allocation2 + $0x48] sm:$0xff]  ;;  %v450_v9 = vpack.c.bf16 %v31_v6, %v29_v4  ;;  %v33_v11 = vld [vmem:[#allocation2 + $0x40] sm:$0xff]  ;;  %v155_v28 = vld [vmem:[#allocation2 + $0x30] sm:$0xff]  ;;  %410 = vmatprep.mubr.msk.f32.mxu1 %vm565_vm0, %v563_v0 }
  0x15   :  { %v36_v8 = vld [vmem:[#allocation2 + $0x68] sm:$0xff]  ;;  %v35_v12 = vld [vmem:[#allocation2 + $0x60] sm:$0xff]  ;;  %v156_v29 = vld [vmem:[#allocation2 + $0x50] sm:$0xff]  ;;  %v481_v31 = vpack.c.bf16 %v155_v28, %v154_v27 }
  0x16   :  { %v452_v10 = vpack.c.bf16 %v36_v8, %v34_v7  ;;  %v38_v13 = vld [vmem:[#allocation2 + $0x88] sm:$0xff]  ;;  %449 = vmatprep.subr.bf16.mxu0 %v448_v5  ;;  %v454_v15 = vpack.c.bf16 %v35_v12, %v33_v11  ;;  %v37_v17 = vld [vmem:[#allocation2 + $0x80] sm:$0xff]  ;;  %v157_v32 = vld [vmem:[#allocation2 + $0x70] sm:$0xff] }
  0x17   :  { %v40_v14 = vld [vmem:[#allocation2 + $0xa8] sm:$0xff]  ;;  %451 = vmatpush1.bf16.msra.mxu0 %v450_v9  ;;  %v39_v18 = vld [vmem:[#allocation2 + $0xa0] sm:$0xff]  ;;  %482 = vmatpush3.bf16.msra.mxu1 %v481_v31  ;;  %v484_v38 = vpack.c.bf16 %v157_v32, %v156_v29  ;;  %v158_v39 = vld [vmem:[#allocation2 + $0x90] sm:$0xff] }
  0x18   :  { %453 = vmatprep.subr.bf16.mxu0 %v452_v10  ;;  %v456_v16 = vpack.c.bf16 %v40_v14, %v38_v13  ;;  %v42_v19 = vld [vmem:[#allocation2 + $0xc8] sm:$0xff]  ;;  %v458_v21 = vpack.c.bf16 %v39_v18, %v37_v17  ;;  %v41_v23 = vld [vmem:[#allocation2 + $0xc0] sm:$0xff]  ;;  %483 = vmatprep.subr.bf16.mxu1 %v564_v1  ;;  %v159_v40 = vld [vmem:[#allocation2 + $0xb0] sm:$0xff] }
  0x19   :  { %v44_v20 = vld [vmem:[#allocation2 + $0xe8] sm:$0xff]  ;;  %v43_v24 = vld [vmem:[#allocation2 + $0xe0] sm:$0xff]  ;;  %v487_v47 = vpack.c.bf16 %v159_v40, %v158_v39  ;;  %v160_v60 = vld [vmem:[#allocation2 + $0xd0] sm:$0xff] }
  0x1a   :  { %v460_v22 = vpack.c.bf16 %v44_v20, %v42_v19  ;;  %v46_v25 = vld [vmem:[#allocation2 + $0x108] sm:$0xff]  ;;  %v462_v30 = vpack.c.bf16 %v43_v24, %v41_v23  ;;  %v45_v34 = vld [vmem:[#allocation2 + $0x100] sm:$0xff]  ;;  %v161_v61 = vld [vmem:[#allocation2 + $0xf0] sm:$0xff] }
  0x1b   :  { %455 = vmatpush1.bf16.msra.mxu0 %v454_v15  ;;  %v48_v26 = vld [vmem:[#allocation2 + $0x128] sm:$0xff]  ;;  %v47_v35 = vld [vmem:[#allocation2 + $0x120] sm:$0xff]  ;;  %485 = vmatpush3.bf16.msra.mxu1 %v484_v38  ;;  %v490_v62 = vpack.c.bf16 %v161_v61, %v160_v60  ;;  %v162_v63 = vld [vmem:[#allocation2 + $0x110] sm:$0xff] }
  0x1c   :  { %457 = vmatprep.subr.bf16.mxu0 %v456_v16  ;;  %v464_v33 = vpack.c.bf16 %v48_v26, %v46_v25  ;;  %v50_v36 = vld [vmem:[#allocation2 + $0x148] sm:$0xff]  ;;  %v466_v41 = vpack.c.bf16 %v47_v35, %v45_v34  ;;  %v49_v43 = vld [vmem:[#allocation2 + $0x140] sm:$0xff]  ;;  %486 = vmatprep.subr.bf16.mxu1 %v564_v1  ;;  %v163_v2 = vld [vmem:[#allocation2 + $0x130] sm:$0xff] }
  0x1d   :  { %v52_v37 = vld [vmem:[#allocation2 + $0x168] sm:$0xff]  ;;  %v51_v44 = vld [vmem:[#allocation2 + $0x160] sm:$0xff]  ;;  %v493_v3 = vpack.c.bf16 %v163_v2, %v162_v63  ;;  %v164_v4 = vld [vmem:[#allocation2 + $0x150] sm:$0xff] }
  0x1e   :  { %v468_v42 = vpack.c.bf16 %v52_v37, %v50_v36  ;;  %v54_v45 = vld [vmem:[#allocation2 + $0x188] sm:$0xff]  ;;  %v470_v48 = vpack.c.bf16 %v51_v44, %v49_v43  ;;  %v53_v50 = vld [vmem:[#allocation2 + $0x180] sm:$0xff]  ;;  %v165_v5 = vld [vmem:[#allocation2 + $0x170] sm:$0xff] }
  0x1f   :  { %459 = vmatpush1.bf16.msra.mxu0 %v458_v21  ;;  %v56_v46 = vld [vmem:[#allocation2 + $0x1a8] sm:$0xff]  ;;  %v55_v51 = vld [vmem:[#allocation2 + $0x1a0] sm:$0xff]  ;;  %488 = vmatpush3.bf16.msra.mxu1 %v487_v47  ;;  %v496_v6 = vpack.c.bf16 %v165_v5, %v164_v4  ;;  %v166_v7 = vld [vmem:[#allocation2 + $0x190] sm:$0xff] }
  0x20   :  { %461 = vmatprep.subr.bf16.mxu0 %v460_v22  ;;  %v472_v49 = vpack.c.bf16 %v56_v46, %v54_v45  ;;  %v58_v52 = vld [vmem:[#allocation2 + $0x1c8] sm:$0xff]  ;;  %489 = vmatprep.subr.bf16.mxu1 %v564_v1  ;;  %v474_v54 = vpack.c.bf16 %v55_v51, %v53_v50  ;;  %v57_v56 = vld [vmem:[#allocation2 + $0x1c0] sm:$0xff]  ;;  %v167_v8 = vld [vmem:[#allocation2 + $0x1b0] sm:$0xff] }
  0x21   :  { %v60_v53 = vld [vmem:[#allocation2 + $0x1e8] sm:$0xff]  ;;  %v59_v57 = vld [vmem:[#allocation2 + $0x1e0] sm:$0xff]  ;;  %v499_v9 = vpack.c.bf16 %v167_v8, %v166_v7  ;;  %v168_v10 = vld [vmem:[#allocation2 + $0x1d0] sm:$0xff] }
  0x22   :  { %v476_v55 = vpack.c.bf16 %v60_v53, %v58_v52  ;;  %v478_v58 = vpack.c.bf16 %v59_v57, %v57_v56  ;;  %v606_v59 = vld [vmem:[%s633_s0] sm:$0xff]  ;;  %v169_v11 = vld [vmem:[#allocation2 + $0x1f0] sm:$0xff]  ;;  %v242_v13 = vld [vmem:[#allocation2 + $0x18] sm:$0xff] }
  0x23   :  { %463 = vmatpush1.bf16.msra.mxu0 %v462_v30  ;;  %491 = vmatpush3.bf16.msra.mxu1 %v490_v62  ;;  %v502_v12 = vpack.c.bf16 %v169_v11, %v168_v10  ;;  %v243_v14 = vld [vmem:[#allocation2 + $0x38] sm:$0xff]  ;;  %v61_v36 = vld [vmem:[%s635_s2] sm:$0x3] }
  0x24   :  { %465 = vmatprep.subr.bf16.mxu0 %v464_v33  ;;  %492 = vmatprep.subr.bf16.mxu1 %v564_v1  ;;  %v244_v15 = vld [vmem:[#allocation2 + $0x58] sm:$0xff]  ;;  %v505_v16 = vpack.c.bf16 %v243_v14, %v242_v13  ;;  %v63_v33 = vlaneseq }
  0x25   :  { %v245_v17 = vld [vmem:[#allocation2 + $0x78] sm:$0xff] }
  0x26   :  { %v508_v18 = vpack.c.bf16 %v245_v17, %v244_v15  ;;  %v247_v19 = vld [vmem:[#allocation2 + $0xb8] sm:$0xff]  ;;  %v64_v34 = vshrl.u32 %v63_v33, 7  ;;  %v145_v43 = vand.u32 127, %v63_v33 }
  0x27   :  { %467 = vmatpush1.bf16.msra.mxu0 %v466_v41  ;;  %494 = vmatpush3.bf16.msra.mxu1 %v493_v3  ;;  %v248_v21 = vld [vmem:[#allocation2 + $0xd8] sm:$0xff] }
  0x28   :  { %469 = vmatprep.subr.bf16.mxu0 %v468_v42  ;;  %495 = vmatprep.subr.bf16.mxu1 %v564_v1  ;;  %v249_v22 = vld [vmem:[#allocation2 + $0xf8] sm:$0xff]  ;;  %v65_v35 = vsub.s32 0, %v64_v34  ;;  %vm146_vm1 = vcmp.ge.s32.totalorder %v145_v43, 64  ;;  %vm147_vm2 = vcmp.lt.s32.totalorder %v145_v43, 84 }
  0x29   :  { %v514_v23 = vpack.c.bf16 %v249_v22, %v248_v21  ;;  %v250_v24 = vld [vmem:[#allocation2 + $0x118] sm:$0xff]  ;;  %vm148_vm3 = vmand %vm146_vm1, %vm147_vm2 }
  0x2a   :  { %v251_v25 = vld [vmem:[#allocation2 + $0x138] sm:$0xff]  ;;  %v66_v37 = vrot.slane %v61_v36, %v65_v35 }
  0x2b   :  { %471 = vmatpush1.bf16.msra.mxu0 %v470_v48  ;;  %497 = vmatpush3.bf16.msra.mxu1 %v496_v6  ;;  %v517_v26 = vpack.c.bf16 %v251_v25, %v250_v24  ;;  %v252_v27 = vld [vmem:[#allocation2 + $0x158] sm:$0xff]  ;;  %v69_v48 = vsub.s32 1, %v64_v34 }
  0x2c   :  { %473 = vmatprep.subr.bf16.mxu0 %v472_v49  ;;  %498 = vmatprep.subr.bf16.mxu1 %v564_v1  ;;  %v253_v28 = vld [vmem:[#allocation2 + $0x178] sm:$0xff] }
  0x2d   :  { %v520_v29 = vpack.c.bf16 %v253_v28, %v252_v27  ;;  %v254_v30 = vld [vmem:[#allocation2 + $0x198] sm:$0xff]  ;;  %v70_v49 = vrot.slane %v61_v36, %v69_v48 }
  0x2e   :  { %v255_v31 = vld [vmem:[#allocation2 + $0x1b8] sm:$0xff] }
  0x2f   :  { %475 = vmatpush1.bf16.msra.mxu0 %v474_v54  ;;  %500 = vmatpush3.bf16.msra.mxu1 %v499_v9  ;;  %v523_v32 = vpack.c.bf16 %v255_v31, %v254_v30  ;;  %v256_v45 = vld [vmem:[#allocation2 + $0x1d8] sm:$0xff] }
  0x30   :  { %477 = vmatprep.subr.bf16.mxu0 %v476_v55  ;;  %501 = vmatprep.subr.bf16.mxu1 %v564_v1  ;;  %v257_v46 = vld [vmem:[#allocation2 + $0x1f8] sm:$0xff]  ;;  %v343_v55 = vld [vmem:[%s635_s2 + $0x3] ss:$0 sm:$0xff] }
  0x31   :  { %v526_v47 = vpack.c.bf16 %v257_v46, %v256_v45 }
  0x33   :  { %479 = vmatpush1.bf16.msra.mxu0 %v478_v58  ;;  %503 = vmatpush3.bf16.msra.mxu1 %v502_v12 }
  0x34   :  { %504 = vmatprep.subr.bf16.mxu0 %v564_v1 }
  0x36   :  { %138 = vmatmul.mubr.f32.vlgmr.msra.gmra.mrb[0].mxu0 %v606_v59 }
  0x37   :  { %445 = vmatprep.mubr.msk.f32.mxu0 %vm565_vm0, %v563_v0  ;;  %506 = vmatpush3.bf16.msra.mxu0 %v505_v16  ;;  %v246_v0 = vld [vmem:[#allocation2 + $0x98] sm:$0xff] }
  0x38   :  { %507 = vmatprep.subr.bf16.mxu0 %v564_v1  ;;  %v511_v20 = vpack.c.bf16 %v247_v19, %v246_v0 }
  0x3b   :  { %509 = vmatpush3.bf16.msra.mxu0 %v508_v18 }
  0x3c   :  { %510 = vmatprep.subr.bf16.mxu0 %v564_v1 }
  0x3f   :  { %512 = vmatpush3.bf16.msra.mxu0 %v511_v20 }
  0x40   :  { %513 = vmatprep.subr.bf16.mxu0 %v564_v1 }
  0x43   :  { %515 = vmatpush3.bf16.msra.mxu0 %v514_v23 }
  0x44   :  { %516 = vmatprep.subr.bf16.mxu0 %v564_v1 }
  0x47   :  { %518 = vmatpush3.bf16.msra.mxu0 %v517_v26 }
  0x48   :  { %519 = vmatprep.subr.bf16.mxu0 %v564_v1 }
  0x4b   :  { %521 = vmatpush3.bf16.msra.mxu0 %v520_v29 }
  0x4c   :  { %522 = vmatprep.subr.bf16.mxu0 %v564_v1 }
  0x4f   :  { %524 = vmatpush3.bf16.msra.mxu0 %v523_v32 }
  0x50   :  { %525 = vmatprep.subr.bf16.mxu0 %v564_v1 }
  0x53   :  { %527 = vmatpush3.bf16.msra.mxu0 %v526_v47 }
 0x109   :  { %v139_v38 = vpop.f32.mrb[0].mxu0 }
 0x10a   :  { %v140_v39 = vadd.f32 %v139_v38, %v66_v37  ;;  %v141_v40 = vpop.f32.mrb[1].mxu0 }
 0x10b   :  { %v142_v50 = vadd.f32 %v141_v40, %v70_v49 }
 0x10c   :  { %v149_v41 = vmul.f32 0.5, %v140_v39 }
 0x10e   :  { %v150_v42 = vmul.f32 1.442695, %v149_v41 }
 0x110   :  { %534 = vpow2.f32 %v150_v42 }
 0x11a   :  { %v535_v44 = vpop.eup %534 }
 0x11b   :  { %v152_v1 = vmul.f32 %v535_v44, %v606_v59 }
 0x11d   :  { %411 = vmatmul.mubr.msk.f32.vlgmr.msra.gmra.mrb[0].mxu1 %vm148_vm3, %v152_v1 }
 0x1f0   :  { %v236_v51 = vpop.f32.mrb[0].mxu1 }
 0x1f1   :  { %v240_v52 = vadd.f32 %v236_v51, %v142_v50  ;;  %v412_v53 = vpop.f32.mrb[1].mxu1 }
 0x1f3   :  { %v241_v54 = vmax.f32 %v240_v52, 0.0 }
 0x1f5   :  { %446 = vmatmul.mubr.f32.vlgmr.msra.gmra.mrb[2].mxu0 %v241_v54 }
 0x2c8   :  { %v331_v56 = vpop.f32.mrb[2].mxu0 }
 0x2c9   :  { %v332_v57 = vadd.f32 %v343_v55, %v331_v56  ;;  %v447_v58 = vpop.f32.mrb[3].mxu0 }
 0x2cb   :  { %v335_v59 = vadd.f32 %v332_v57, %v140_v39 }
 0x2cd   :  { %336 = vst [vmem:[%s636_s3] sm:$0xff] %v335_v59 }
 0x2ce   :  { %341 = vsyncpa [#allocation3], 1 }

</bundles_post_ra>
